<compile_context>
chip_gen: v5e
topology: v5e:2x2
jax: 0.10.0
libtpu: 0.0.40
codegen_flags: <defaults>
</compile_context>

<pallas_src>
import jax
import jax.numpy as jnp
from jax.experimental import pallas as pl
from jax.experimental.pallas import tpu as pltpu

LANE = 128                   # pad feature dims to a multiple of the lane width
MAX_TB = 1024                # upper bound on rows per grid step
ACT_VMEM_BUDGET = 8 << 20    # activation VMEM budget used to derive TB


def _round_up(n, m):
    return ((n + m - 1) // m) * m


def _sigmoid(x):
    # sigmoid(x) = 0.5*tanh(0.5*x) + 0.5 : a single EUP op (tanh); the scale/
    # shift are cheap VPU filler.  More accurate than exp + approx reciprocal.
    return 0.5 * jnp.tanh(0.5 * x) + 0.5


def mlp4_kernel(x_ref, w1_ref, b1_ref, w2_ref, b2_ref, w3_ref, b3_ref, o_ref):
    # fc1: Linear(Dp, H1p) + Sigmoid  (bf16 MXU, f32 accumulate)
    h1 = jnp.dot(x_ref[...], w1_ref[...],
                 preferred_element_type=jnp.float32) + b1_ref[...]
    h1 = _sigmoid(h1).astype(jnp.bfloat16)
    # fc2: Linear(H1p, H2p) + Sigmoid
    h2 = jnp.dot(h1, w2_ref[...],
                 preferred_element_type=jnp.float32) + b2_ref[...]
    h2 = _sigmoid(h2).astype(jnp.bfloat16)
    # fc3: Linear(H2p, Kp) (no activation)
    out = jnp.dot(h2, w3_ref[...],
                  preferred_element_type=jnp.float32) + b3_ref[...]
    o_ref[...] = out.astype(o_ref.dtype)


def prepare_params(params, weight_dtype=jnp.bfloat16):
    """One-time (init-time) prep of PyTorch-layout params.

    * Transposes (out, in) -> (in, out).
    * Zero-pads every feature dim (D, H1, H2, K) up to a multiple of 128 lanes
      so every contraction / bias add / store is lane-dense.  Padded activation
      lanes hold sigmoid(0)=0.5 but are multiplied by zero-padded weight rows,
      so they never reach real outputs; padded K columns are cropped outside.
    * Weights stored in bf16 (MXU-native, halves HBM/VMEM bytes); biases stay
      f32 (tiny) so the bias add happens in f32.
    """
    def pad_to(a, shape):
        return jnp.pad(a, [(0, t - s) for s, t in zip(a.shape, shape)])

    w1 = jnp.asarray(params["w1"]).T   # (D,  H1)
    w2 = jnp.asarray(params["w2"]).T   # (H1, H2)
    w3 = jnp.asarray(params["w3"]).T   # (H2, K)
    D, H1 = w1.shape
    _, H2 = w2.shape
    _, K = w3.shape
    Dp, H1p, H2p, Kp = (_round_up(n, LANE) for n in (D, H1, H2, K))

    return {
        "w1": pad_to(w1, (Dp, H1p)).astype(weight_dtype),
        "b1": pad_to(jnp.asarray(params["b1"]).reshape(1, -1), (1, H1p)).astype(jnp.float32),
        "w2": pad_to(w2, (H1p, H2p)).astype(weight_dtype),
        "b2": pad_to(jnp.asarray(params["b2"]).reshape(1, -1), (1, H2p)).astype(jnp.float32),
        "w3": pad_to(w3, (H2p, Kp)).astype(weight_dtype),
        "b3": pad_to(jnp.asarray(params["b3"]).reshape(1, -1), (1, Kp)).astype(jnp.float32),
        "D": D,
        "K": K,
    }


def _choose_tb(B, Dp, Kp):
    """Pick the batch tile from a VMEM budget; guarantee >= 2 grid tiles when
    B >= 16 so v7x's second TensorCore is not idle."""
    if B <= 16:
        return B                      # single tile; block equals full array dim (legal)
    # Per-row VMEM bytes: x tile (bf16, 2 buffers) + out tile (f32, 2 buffers)
    # + headroom for the f32 128-wide intermediates (h1 / h2 / out).
    per_row = Dp * 2 * 2 + Kp * 4 * 2 + 4 * LANE * 4
    tb = max(8, (ACT_VMEM_BUDGET // per_row) // 8 * 8)
    tb = min(tb, MAX_TB)
    tb = min(tb, _round_up(pl.cdiv(B, 2), 8))   # at least 2 grid steps
    return tb


def mlp4_forward(x, prepared):
    """x: (B, ...) any trailing shape; prepared: output of prepare_params."""
    B = x.shape[0]
    x2d = x.reshape(B, -1)             # nn.Flatten
    D = prepared["D"]
    assert x2d.shape[1] == D, (x2d.shape, D)
    K = prepared["K"]

    w1, b1 = prepared["w1"], prepared["b1"]
    w2, b2 = prepared["w2"], prepared["b2"]
    w3, b3 = prepared["w3"], prepared["b3"]
    Dp = w1.shape[0]
    Kp = w3.shape[1]

    TB = _choose_tb(B, Dp, Kp)
    Bp = _round_up(B, TB)

    # Cast activations to bf16 (HBM-bound kernel: halves x traffic); pad batch
    # and/or flatten dims in one shot only when actually needed.
    xk = x2d.astype(jnp.bfloat16)
    if Bp != B or Dp != D:
        xk = jnp.pad(xk, ((0, Bp - B), (0, Dp - D)))

    # VMEM accounting: weights single-buffered, x/out double-buffered.
    weight_bytes = sum(int(a.size) * a.dtype.itemsize
                       for a in (w1, w2, w3, b1, b2, b3))
    act_bytes = TB * (Dp * 2 * 2 + Kp * 4 * 2) + 4 * TB * LANE * 4
    vmem_limit = int(min(max(2 * (weight_bytes + act_bytes), 16 << 20), 48 << 20))

    resident = dict(pipeline_mode=pl.Buffered(1))   # constant blocks: 1 buffer, not 2

    out_p = pl.pallas_call(
        mlp4_kernel,
        out_shape=jax.ShapeDtypeStruct((Bp, Kp), jnp.float32),
        grid_spec=pltpu.PrefetchScalarGridSpec(
            num_scalar_prefetch=0,
            grid=(Bp // TB,),
            in_specs=[
                # activations: tiled over the batch grid (auto double-buffered)
                pl.BlockSpec((TB, Dp), lambda i: (i, 0)),
                # weights / biases: constant index_map -> resident, single-buffered
                pl.BlockSpec(w1.shape, lambda i: (0, 0), **resident),
                pl.BlockSpec(b1.shape, lambda i: (0, 0), **resident),
                pl.BlockSpec(w2.shape, lambda i: (0, 0), **resident),
                pl.BlockSpec(b2.shape, lambda i: (0, 0), **resident),
                pl.BlockSpec(w3.shape, lambda i: (0, 0), **resident),
                pl.BlockSpec(b3.shape, lambda i: (0, 0), **resident),
            ],
            out_specs=pl.BlockSpec((TB, Kp), lambda i: (i, 0)),
        ),
        compiler_params=pltpu.CompilerParams(
            dimension_semantics=("parallel",),   # megacore: split batch tiles across TCs
            vmem_limit_bytes=vmem_limit,
        ),
    )(xk, w1, b1, w2, b2, w3, b3)

    # TODO(synk): for very large flatten dims (resident w1 = Dp*128*2 bytes vs
    # v7x's 32 MiB scoped / 64 MiB physical VMEM) add a reduction grid axis over
    # D with a f32 VMEM accumulator (pl.when init) and run layers 2/3 on the
    # last k step.

    if Bp != B or Kp != K:
        out_p = out_p[:B, :K]          # crop pad only when padding actually occurred
    return out_p


def init_params(key, D, H1, H2, K, dtype=jnp.float32):
    """Deterministic init mimicking nn.Linear's uniform(-1/sqrt(in), 1/sqrt(in))."""
    ks = jax.random.split(key, 6)

    def lin(kw, kb, fan_in, fan_out):
        bound = 1.0 / jnp.sqrt(fan_in)
        w = jax.random.uniform(kw, (fan_out, fan_in), dtype, -bound, bound)
        b = jax.random.uniform(kb, (fan_out,), dtype, -bound, bound)
        return w, b

    w1, b1 = lin(ks[0], ks[1], D, H1)
    w2, b2 = lin(ks[2], ks[3], H1, H2)
    w3, b3 = lin(ks[4], ks[5], H2, K)
    return {"w1": w1, "b1": b1, "w2": w2, "b2": b2, "w3": w3, "b3": b3}


def mlp4_reference(x, params):
    """Pure-JAX f32 reference of the PyTorch forward (exact sigmoid)."""
    B = x.shape[0]
    h = x.reshape(B, -1)
    h = jax.nn.sigmoid(h @ params["w1"].T + params["b1"])
    h = jax.nn.sigmoid(h @ params["w2"].T + params["b2"])
    return h @ params["w3"].T + params["b3"]


if __name__ == "__main__":
    # Small shapes: input (B=2, C=4, 16, 16) -> D = 1024, H1 = 32, H2 = 32, K = 16
    B, C, Hs, Ws = 2, 4, 16, 16
    D, H1, H2, K = C * Hs * Ws, 32, 32, 16

    key = jax.random.PRNGKey(0)
    kx, kp = jax.random.split(key)
    x = jax.random.normal(kx, (B, C, Hs, Ws), jnp.float32)
    params = init_params(kp, D, H1, H2, K)

    prepared = prepare_params(params)    # one-time: transpose + lane-pad + bf16 cast

    out = mlp4_forward(x, prepared)
    out = jax.block_until_ready(out)

    ref = mlp4_reference(x, params)
    assert out.shape == (B, K), out.shape
    max_err = float(jnp.max(jnp.abs(out - ref)))
    # Tolerance reflects bf16 activations/weights on the MXU (f32 accumulation).
    assert jnp.allclose(out, ref, atol=2e-2, rtol=2e-2), f"mismatch vs reference (max abs err {max_err})"

    print("KERNEL_OK")
</pallas_src>

<mosaic_0001>
module attributes {stable_mosaic.version = 11 : i64} {
  func.func @mlp4_kernel(%arg0: i32, %arg1: memref<2x1024xbf16, #tpu.memory_space<vmem>>, %arg2: memref<1024x128xbf16, #tpu.memory_space<vmem>>, %arg3: memref<1x128xf32, #tpu.memory_space<vmem>>, %arg4: memref<128x128xbf16, #tpu.memory_space<vmem>>, %arg5: memref<1x128xf32, #tpu.memory_space<vmem>>, %arg6: memref<128x128xbf16, #tpu.memory_space<vmem>>, %arg7: memref<1x128xf32, #tpu.memory_space<vmem>>, %arg8: memref<2x128xf32, #tpu.memory_space<vmem>>) attributes {dimension_semantics = [#tpu.dimension_semantics<parallel>], iteration_bounds = array<i64: 1>, scalar_prefetch = 0 : i64, scratch_operands = 0 : i64, tpu.core_type = #tpu.core_type<tc>, window_params = [{transform_indices = @transform_0, window_bounds = array<i64: 2, 1024>}, {pipeline_mode = #tpu.pipeline_mode<synchronous>, transform_indices = @transform_1, window_bounds = array<i64: 1024, 128>}, {pipeline_mode = #tpu.pipeline_mode<synchronous>, transform_indices = @transform_2, window_bounds = array<i64: 1, 128>}, {pipeline_mode = #tpu.pipeline_mode<synchronous>, transform_indices = @transform_3, window_bounds = array<i64: 128, 128>}, {pipeline_mode = #tpu.pipeline_mode<synchronous>, transform_indices = @transform_4, window_bounds = array<i64: 1, 128>}, {pipeline_mode = #tpu.pipeline_mode<synchronous>, transform_indices = @transform_5, window_bounds = array<i64: 128, 128>}, {pipeline_mode = #tpu.pipeline_mode<synchronous>, transform_indices = @transform_6, window_bounds = array<i64: 1, 128>}, {transform_indices = @transform_7, window_bounds = array<i64: 2, 128>}]} {
    %c0 = arith.constant 0 : index
    %c0_0 = arith.constant 0 : index
    %0 = vector.load %arg1[%c0, %c0_0] : memref<2x1024xbf16, #tpu.memory_space<vmem>>, vector<2x1024xbf16>
    %c0_1 = arith.constant 0 : index
    %c0_2 = arith.constant 0 : index
    %1 = vector.load %arg2[%c0_1, %c0_2] : memref<1024x128xbf16, #tpu.memory_space<vmem>>, vector<1024x128xbf16>
    %cst = arith.constant dense<0.000000e+00> : vector<2x128xf32>
    %2 = tpu.matmul %0, %1, %cst {dimension_numbers = #tpu.dot_dimension_numbers<[1], [0], [0], [1], [0, 0, 1, 1], [], []>} : vector<2x1024xbf16>, vector<1024x128xbf16>, vector<2x128xf32> -> vector<2x128xf32>
    %c0_3 = arith.constant 0 : index
    %c0_4 = arith.constant 0 : index
    %3 = vector.load %arg3[%c0_3, %c0_4] : memref<1x128xf32, #tpu.memory_space<vmem>>, vector<1x128xf32>
    %4 = vector.broadcast %3 : vector<1x128xf32> to vector<2x128xf32>
    %5 = arith.addf %2, %4 : vector<2x128xf32>
    %cst_5 = arith.constant 5.000000e-01 : f32
    %6 = vector.broadcast %cst_5 : f32 to vector<2x128xf32>
    %7 = arith.mulf %6, %5 : vector<2x128xf32>
    %8 = math.tanh %7 : vector<2x128xf32>
    %cst_6 = arith.constant 5.000000e-01 : f32
    %9 = vector.broadcast %cst_6 : f32 to vector<2x128xf32>
    %10 = arith.mulf %9, %8 : vector<2x128xf32>
    %cst_7 = arith.constant 5.000000e-01 : f32
    %11 = vector.broadcast %cst_7 : f32 to vector<2x128xf32>
    %12 = arith.addf %10, %11 : vector<2x128xf32>
    %13 = arith.truncf %12 : vector<2x128xf32> to vector<2x128xbf16>
    %c0_8 = arith.constant 0 : index
    %c0_9 = arith.constant 0 : index
    %14 = vector.load %arg4[%c0_8, %c0_9] : memref<128x128xbf16, #tpu.memory_space<vmem>>, vector<128x128xbf16>
    %cst_10 = arith.constant dense<0.000000e+00> : vector<2x128xf32>
    %15 = tpu.matmul %13, %14, %cst_10 {dimension_numbers = #tpu.dot_dimension_numbers<[1], [0], [0], [1], [0, 0, 1, 1], [], []>} : vector<2x128xbf16>, vector<128x128xbf16>, vector<2x128xf32> -> vector<2x128xf32>
    %c0_11 = arith.constant 0 : index
    %c0_12 = arith.constant 0 : index
    %16 = vector.load %arg5[%c0_11, %c0_12] : memref<1x128xf32, #tpu.memory_space<vmem>>, vector<1x128xf32>
    %17 = vector.broadcast %16 : vector<1x128xf32> to vector<2x128xf32>
    %18 = arith.addf %15, %17 : vector<2x128xf32>
    %cst_13 = arith.constant 5.000000e-01 : f32
    %19 = vector.broadcast %cst_13 : f32 to vector<2x128xf32>
    %20 = arith.mulf %19, %18 : vector<2x128xf32>
    %21 = math.tanh %20 : vector<2x128xf32>
    %cst_14 = arith.constant 5.000000e-01 : f32
    %22 = vector.broadcast %cst_14 : f32 to vector<2x128xf32>
    %23 = arith.mulf %22, %21 : vector<2x128xf32>
    %cst_15 = arith.constant 5.000000e-01 : f32
    %24 = vector.broadcast %cst_15 : f32 to vector<2x128xf32>
    %25 = arith.addf %23, %24 : vector<2x128xf32>
    %26 = arith.truncf %25 : vector<2x128xf32> to vector<2x128xbf16>
    %c0_16 = arith.constant 0 : index
    %c0_17 = arith.constant 0 : index
    %27 = vector.load %arg6[%c0_16, %c0_17] : memref<128x128xbf16, #tpu.memory_space<vmem>>, vector<128x128xbf16>
    %cst_18 = arith.constant dense<0.000000e+00> : vector<2x128xf32>
    %28 = tpu.matmul %26, %27, %cst_18 {dimension_numbers = #tpu.dot_dimension_numbers<[1], [0], [0], [1], [0, 0, 1, 1], [], []>} : vector<2x128xbf16>, vector<128x128xbf16>, vector<2x128xf32> -> vector<2x128xf32>
    %c0_19 = arith.constant 0 : index
    %c0_20 = arith.constant 0 : index
    %29 = vector.load %arg7[%c0_19, %c0_20] : memref<1x128xf32, #tpu.memory_space<vmem>>, vector<1x128xf32>
    %30 = vector.broadcast %29 : vector<1x128xf32> to vector<2x128xf32>
    %31 = arith.addf %28, %30 : vector<2x128xf32>
    %c0_21 = arith.constant 0 : index
    %c0_22 = arith.constant 0 : index
    %32 = vector.load %arg8[%c0_21, %c0_22] : memref<2x128xf32, #tpu.memory_space<vmem>>, vector<2x128xf32>
    tpu.vector_store %arg8[%c0_21, %c0_22], %31 {strides = array<i32>} : memref<2x128xf32, #tpu.memory_space<vmem>>, vector<2x128xf32>,
    return
  }
  func.func @transform_0(%arg0: i32) -> (i32, i32) {
    %c0_i32 = arith.constant 0 : i32
    %c0_i32_0 = arith.constant 0 : i32
    return %arg0, %c0_i32 : i32, i32
  }
  func.func @transform_1(%arg0: i32) -> (i32, i32) {
    %c0_i32 = arith.constant 0 : i32
    %c0_i32_0 = arith.constant 0 : i32
    %c0_i32_1 = arith.constant 0 : i32
    return %c0_i32, %c0_i32_0 : i32, i32
  }
  func.func @transform_2(%arg0: i32) -> (i32, i32) {
    %c0_i32 = arith.constant 0 : i32
    %c0_i32_0 = arith.constant 0 : i32
    %c0_i32_1 = arith.constant 0 : i32
    return %c0_i32, %c0_i32_0 : i32, i32
  }
  func.func @transform_3(%arg0: i32) -> (i32, i32) {
    %c0_i32 = arith.constant 0 : i32
    %c0_i32_0 = arith.constant 0 : i32
    %c0_i32_1 = arith.constant 0 : i32
    return %c0_i32, %c0_i32_0 : i32, i32
  }
  func.func @transform_4(%arg0: i32) -> (i32, i32) {
    %c0_i32 = arith.constant 0 : i32
    %c0_i32_0 = arith.constant 0 : i32
    %c0_i32_1 = arith.constant 0 : i32
    return %c0_i32, %c0_i32_0 : i32, i32
  }
  func.func @transform_5(%arg0: i32) -> (i32, i32) {
    %c0_i32 = arith.constant 0 : i32
    %c0_i32_0 = arith.constant 0 : i32
    %c0_i32_1 = arith.constant 0 : i32
    return %c0_i32, %c0_i32_0 : i32, i32
  }
  func.func @transform_6(%arg0: i32) -> (i32, i32) {
    %c0_i32 = arith.constant 0 : i32
    %c0_i32_0 = arith.constant 0 : i32
    %c0_i32_1 = arith.constant 0 : i32
    return %c0_i32, %c0_i32_0 : i32, i32
  }
  func.func @transform_7(%arg0: i32) -> (i32, i32) {
    %c0_i32 = arith.constant 0 : i32
    %c0_i32_0 = arith.constant 0 : i32
    return %arg0, %c0_i32 : i32, i32
  }
}

</mosaic_0001>

<bundles_post_ra>
// kernel: tpu_custom_call.1
= control target key start
LH: loop header
LB: loop body
LE: loop exit
PB: predicated region body
PF: predicated region fallthrough
CT: control target
= control target key end

     0   :  { %12 = vsyncpa [#allocation3], 0  ;;  %s1532_s0 = inlined_call_operand.hbm [shape: bf16[2,1024], index: 0, kind: input, shape index: {}]   ;;  %s1533_s1 = inlined_call_operand.hbm [shape: bf16[1024,128], index: 1, kind: input, shape index: {}]   ;;  %s1534_s2 = inlined_call_operand.vmem [shape: f32[1,128], index: 2, kind: input, shape index: {}]   ;;  %s1535_s3 = inlined_call_operand.hbm [shape: bf16[128,128], index: 3, kind: input, shape index: {}]   ;;  %s1536_s4 = inlined_call_operand.vmem [shape: f32[1,128], index: 4, kind: input, shape index: {}]   ;;  %s1537_s5 = inlined_call_operand.hbm [shape: bf16[128,128], index: 5, kind: input, shape index: {}]   ;;  %s1538_s6 = inlined_call_operand.vmem [shape: f32[1,128], index: 6, kind: input, shape index: {}]   ;;  %s1539_s7 = inlined_call_operand.hbm [shape: f32[2,128], index: 7, kind: output, shape index: {}]  }
   0x1   :  { %13 = vsyncpa [#allocation6], 0 }
   0x2   :  { %14 = vsyncpa [#allocation9], 0  ;;  %s31_s26 = sshll.u32 %s1533_s1, 4  ;;  %s32_s26 = int_to_ptr.hbm [resolvable:$true] %s31_s26 }
   0x3   :  { %15 = vsyncpa [#allocation4], 0  ;;  %s1461_s27 = smov [#allocation5]   ;;  %s21_s8 = sshll.u32 %s1532_s0, 4  ;;  %s22_s8 = int_to_ptr.hbm [resolvable:$true] %s21_s8 }
   0x4   :  { %s33_s28 = sshll.u32 %s1461_s27, 4  ;;  %s1462_s9 = smov 64   ;;  %s34_s28 = int_to_ptr.vmem [resolvable:$true] %s33_s28 }
   0x5   :  { %s1463_s10 = smov 4   ;;  %s1464_s11 = smov [#allocation2]  }
   0x6   :  { %39 = dma.hbm_to_vmem [thread:$0]  %s32_s26, 8192, %s34_s28, [#allocation6], %s1462_s9, %s1462_s9, %s1463_s10  }
   0x7   :  { %s23_s12 = sshll.u32 %s1464_s11, 4  ;;  %s46_s15 = sshll.u32 %s1535_s3, 4  ;;  %s24_s12 = int_to_ptr.vmem [resolvable:$true] %s23_s12  ;;  %s47_s15 = int_to_ptr.hbm [resolvable:$true] %s46_s15 }
   0x8   :  { %26 = dma.hbm_to_vmem [thread:$0]  %s22_s8, 128, %s24_s12, [#allocation3]  }
   0x9   :  { %s61_s17 = sshll.u32 %s1537_s5, 4  ;;  %s1465_s18 = smov [#allocation7]   ;;  %s62_s17 = int_to_ptr.hbm [resolvable:$true] %s61_s17 }
   0xa   :  { %s48_s19 = sshll.u32 %s1465_s18, 4  ;;  %s1466_s0 = smov [#allocation8]   ;;  %s49_s19 = int_to_ptr.vmem [resolvable:$true] %s48_s19 }
   0xb   :  { %54 = dma.hbm_to_vmem [thread:$0]  %s47_s15, 1024, %s49_s19, [#allocation6], %s1462_s9, %s1462_s9, %s1463_s10  }
   0xc   :  { %s63_s20 = sshll.u32 %s1466_s0, 4  ;;  %s64_s20 = int_to_ptr.vmem [resolvable:$true] %s63_s20 }
   0xd   :  { %69 = dma.hbm_to_vmem [thread:$0]  %s62_s17, 1024, %s64_s20, [#allocation9], %s1462_s9, %s1462_s9, %s1463_s10  }
   0xe   :  { %1453 = dma.done.wait [#allocation3], 128  }
   0xf   :  { %1454 = vsyncadd [#allocation3], 4294967168 }
  0x10   :  { %1455 = dma.done.wait [#allocation6], 9216  }
  0x11   :  { %1456 = vsyncadd [#allocation6], 4294958080 }
  0x12   :  { %1457 = dma.done.wait [#allocation9], 1024  }
  0x13   :  { %1458 = vsyncadd [#allocation9], 4294966272  ;;  %v1246_v0 = vld [vmem:[#allocation5 + $0x38] sm:$0xff]  ;;  %v1245_v4 = vld [vmem:[#allocation5 + $0x30] sm:$0xff]  ;;  %s1467_s24 = smov [#allocation10]  }
  0x14   :  { %v1254_v1 = vld [vmem:[#allocation5 + $0x78] sm:$0xff]  ;;  %623 = vmatpush.bf16.msra.mxu0 %v1246_v0  ;;  %v1253_v5 = vld [vmem:[#allocation5 + $0x70] sm:$0xff]  ;;  %v1244_v8 = vld [vmem:[#allocation5 + $0x28] sm:$0xff]  ;;  %s905_s25 = sshll.u32 %s1467_s24, 4  ;;  %s906_s25 = int_to_ptr.vmem [resolvable:$true] %s905_s25 }
  0x15   :  { %v1262_v2 = vld [vmem:[#allocation5 + $0xb8] sm:$0xff]  ;;  %636 = vmatpush.bf16.msra.mxu1 %v1254_v1  ;;  %v1261_v6 = vld [vmem:[#allocation5 + $0xb0] sm:$0xff]  ;;  %v1252_v9 = vld [vmem:[#allocation5 + $0x68] sm:$0xff] }
  0x16   :  { %v1270_v3 = vld [vmem:[#allocation5 + $0xf8] sm:$0xff]  ;;  %649 = vmatpush.bf16.msra.mxu2 %v1262_v2  ;;  %v1269_v7 = vld [vmem:[#allocation5 + $0xf0] sm:$0xff]  ;;  %v1260_v10 = vld [vmem:[#allocation5 + $0xa8] sm:$0xff] }
  0x17   :  { %662 = vmatpush.bf16.msra.mxu3 %v1270_v3  ;;  %v1268_v11 = vld [vmem:[#allocation5 + $0xe8] sm:$0xff]  ;;  %v1243_v12 = vld [vmem:[#allocation5 + $0x20] sm:$0xff]  ;;  %v88_v16 = vld [vmem:[#allocation2] sm:$0xff] }
  0x18   :  { %624 = vmatpush.bf16.msra.mxu0 %v1245_v4  ;;  %v1251_v13 = vld [vmem:[#allocation5 + $0x60] sm:$0xff]  ;;  %v1242_v17 = vld [vmem:[#allocation5 + $0x18] sm:$0xff]  ;;  %222 = vst [vmem:[#allocation1] ss:$9 sm:$0xff] %v88_v16  ;;  %v1241_v21 = vld [vmem:[#allocation5 + $0x10] sm:$0xff] }
  0x19   :  { %637 = vmatpush.bf16.msra.mxu1 %v1253_v5  ;;  %v1259_v14 = vld [vmem:[#allocation5 + $0xa0] sm:$0xff]  ;;  %v1250_v18 = vld [vmem:[#allocation5 + $0x58] sm:$0xff]  ;;  %v1249_v22 = vld [vmem:[#allocation5 + $0x50] sm:$0xff] }
  0x1a   :  { %650 = vmatpush.bf16.msra.mxu2 %v1261_v6  ;;  %v1267_v15 = vld [vmem:[#allocation5 + $0xe0] sm:$0xff]  ;;  %v1258_v19 = vld [vmem:[#allocation5 + $0x98] sm:$0xff]  ;;  %v1257_v23 = vld [vmem:[#allocation5 + $0x90] sm:$0xff] }
  0x1b   :  { %663 = vmatpush.bf16.msra.mxu3 %v1269_v7  ;;  %v1266_v20 = vld [vmem:[#allocation5 + $0xd8] sm:$0xff]  ;;  %v1265_v24 = vld [vmem:[#allocation5 + $0xd0] sm:$0xff]  ;;  %v1240_v25 = vld [vmem:[#allocation5 + $0x8] sm:$0xff] }
  0x1c   :  { %625 = vmatpush.bf16.msra.mxu0 %v1244_v8  ;;  %v1248_v26 = vld [vmem:[#allocation5 + $0x48] sm:$0xff]  ;;  %v1239_v29 = vld [vmem:[#allocation5] sm:$0xff]  ;;  %v1278_v33 = vld [vmem:[#allocation5 + $0x138] sm:$0xff] }
  0x1d   :  { %638 = vmatpush.bf16.msra.mxu1 %v1252_v9  ;;  %v1256_v27 = vld [vmem:[#allocation5 + $0x88] sm:$0xff]  ;;  %v1247_v30 = vld [vmem:[#allocation5 + $0x40] sm:$0xff]  ;;  %v1286_v34 = vld [vmem:[#allocation5 + $0x178] sm:$0xff] }
  0x1e   :  { %651 = vmatpush.bf16.msra.mxu2 %v1260_v10  ;;  %v1264_v28 = vld [vmem:[#allocation5 + $0xc8] sm:$0xff]  ;;  %v1255_v31 = vld [vmem:[#allocation5 + $0x80] sm:$0xff]  ;;  %v1294_v35 = vld [vmem:[#allocation5 + $0x1b8] sm:$0xff] }
  0x1f   :  { %664 = vmatpush.bf16.msra.mxu3 %v1268_v11  ;;  %v1263_v32 = vld [vmem:[#allocation5 + $0xc0] sm:$0xff]  ;;  %v1302_v36 = vld [vmem:[#allocation5 + $0x1f8] sm:$0xff]  ;;  %v1277_v37 = vld [vmem:[#allocation5 + $0x130] sm:$0xff] }
  0x20   :  { %626 = vmatpush.bf16.msra.mxu0 %v1243_v12  ;;  %v225_v38 = vld [vmem:[#allocation1 + $0x12] sm:$0xff]  ;;  %v223_v39 = vld [vmem:[#allocation1] sm:$0xff]  ;;  %v224_v42 = vld [vmem:[#allocation1 + $0x9] sm:$0xff] }
  0x21   :  { %639 = vmatpush.bf16.msra.mxu1 %v1251_v13  ;;  %v1285_v40 = vld [vmem:[#allocation5 + $0x170] sm:$0xff]  ;;  %v1276_v45 = vld [vmem:[#allocation5 + $0x128] sm:$0xff]  ;;  %v1275_v49 = vld [vmem:[#allocation5 + $0x120] sm:$0xff] }
  0x22   :  { %652 = vmatpush.bf16.msra.mxu2 %v1259_v14  ;;  %v226_v41 = vld [vmem:[#allocation1 + $0x1b] sm:$0xff]  ;;  %v1283_v50 = vld [vmem:[#allocation5 + $0x160] sm:$0xff]  ;;  %v1274_v53 = vld [vmem:[#allocation5 + $0x118] sm:$0xff] }
  0x23   :  { %665 = vmatpush.bf16.msra.mxu3 %v1267_v15  ;;  %v1293_v43 = vld [vmem:[#allocation5 + $0x1b0] sm:$0xff]  ;;  %v1284_v46 = vld [vmem:[#allocation5 + $0x168] sm:$0xff]  ;;  %v1291_v51 = vld [vmem:[#allocation5 + $0x1a0] sm:$0xff] }
  0x24   :  { %627 = vmatpush.bf16.msra.mxu0 %v1242_v17  ;;  %v1301_v44 = vld [vmem:[#allocation5 + $0x1f0] sm:$0xff]  ;;  %v1292_v47 = vld [vmem:[#allocation5 + $0x1a8] sm:$0xff]  ;;  %v1299_v52 = vld [vmem:[#allocation5 + $0x1e0] sm:$0xff] }
  0x25   :  { %640 = vmatpush.bf16.msra.mxu1 %v1250_v18  ;;  %v1300_v48 = vld [vmem:[#allocation5 + $0x1e8] sm:$0xff]  ;;  %v1282_v54 = vld [vmem:[#allocation5 + $0x158] sm:$0xff]  ;;  %v1273_v57 = vld [vmem:[#allocation5 + $0x110] sm:$0xff] }
  0x26   :  { %653 = vmatpush.bf16.msra.mxu2 %v1258_v19  ;;  %v1290_v55 = vld [vmem:[#allocation5 + $0x198] sm:$0xff]  ;;  %v1281_v58 = vld [vmem:[#allocation5 + $0x150] sm:$0xff]  ;;  %v1272_v61 = vld [vmem:[#allocation5 + $0x108] sm:$0xff] }
  0x27   :  { %666 = vmatpush.bf16.msra.mxu3 %v1266_v20  ;;  %v1298_v56 = vld [vmem:[#allocation5 + $0x1d8] sm:$0xff]  ;;  %v1289_v59 = vld [vmem:[#allocation5 + $0x190] sm:$0xff]  ;;  %v1280_v62 = vld [vmem:[#allocation5 + $0x148] sm:$0xff] }
  0x28   :  { %628 = vmatpush.bf16.msra.mxu0 %v1241_v21  ;;  %v1297_v60 = vld [vmem:[#allocation5 + $0x1d0] sm:$0xff]  ;;  %v1288_v63 = vld [vmem:[#allocation5 + $0x188] sm:$0xff]  ;;  %v1271_v1 = vld [vmem:[#allocation5 + $0x100] sm:$0xff] }
  0x29   :  { %641 = vmatpush.bf16.msra.mxu1 %v1249_v22  ;;  %v1296_v0 = vld [vmem:[#allocation5 + $0x1c8] sm:$0xff]  ;;  %v1279_v2 = vld [vmem:[#allocation5 + $0x140] sm:$0xff]  ;;  %v227_v5 = vld [vmem:[#allocation1 + $0x24] sm:$0xff] }
  0x2a   :  { %654 = vmatpush.bf16.msra.mxu2 %v1257_v23  ;;  %v1287_v3 = vld [vmem:[#allocation5 + $0x180] sm:$0xff]  ;;  %v230_v8 = vld [vmem:[#allocation1 + $0x3f] sm:$0xff]  ;;  %v1310_v9 = vld [vmem:[#allocation7 + $0x38] sm:$0xff] }
  0x2b   :  { %667 = vmatpush.bf16.msra.mxu3 %v1265_v24  ;;  %v1295_v4 = vld [vmem:[#allocation5 + $0x1c0] sm:$0xff]  ;;  %v1309_v10 = vld [vmem:[#allocation7 + $0x30] sm:$0xff]  ;;  %v1308_v11 = vld [vmem:[#allocation7 + $0x28] sm:$0xff] }
  0x2c   :  { %629 = vmatpush.bf16.msra.mxu0 %v1240_v25  ;;  %v228_v6 = vld [vmem:[#allocation1 + $0x2d] sm:$0xff]  ;;  %v229_v7 = vld [vmem:[#allocation1 + $0x36] sm:$0xff]  ;;  %v1305_v20 = vld [vmem:[#allocation7 + $0x10] sm:$0xff] }
  0x2d   :  { %642 = vmatpush.bf16.msra.mxu1 %v1248_v26  ;;  %v1307_v14 = vld [vmem:[#allocation7 + $0x20] sm:$0xff]  ;;  %v1306_v17 = vld [vmem:[#allocation7 + $0x18] sm:$0xff]  ;;  %v1326_v21 = vld [vmem:[%s1534_s2] ss:$0 sm:$0xff] }
  0x2e   :  { %655 = vmatpush.bf16.msra.mxu2 %v1256_v27  ;;  %v1304_v24 = vld [vmem:[#allocation7 + $0x8] sm:$0xff]  ;;  %v1303_v26 = vld [vmem:[#allocation7] sm:$0xff] }
  0x2f   :  { %668 = vmatpush.bf16.msra.mxu3 %v1264_v28  ;;  %v1318_v28 = vld [vmem:[#allocation8 + $0x38] sm:$0xff] }
  0x30   :  { %630 = vmatpush.bf16.msra.mxu0 %v1239_v29 }
  0x31   :  { %643 = vmatpush.bf16.msra.mxu1 %v1247_v30  ;;  %v1317_v30 = vld [vmem:[#allocation8 + $0x30] sm:$0xff] }
  0x32   :  { %656 = vmatpush.bf16.msra.mxu2 %v1255_v31 }
  0x33   :  { %669 = vmatpush.bf16.msra.mxu3 %v1263_v32  ;;  %631 = vmatmul.bf16.vlgmr.msra.gmra.mxu0 %v223_v39 }
  0x34   :  { %675 = vmatpush.bf16.msrb.mxu0 %v1278_v33  ;;  %644 = vmatmul.bf16.vlgmr.msra.gmra.mxu1 %v224_v42 }
  0x35   :  { %688 = vmatpush.bf16.msrb.mxu1 %v1286_v34  ;;  %657 = vmatmul.bf16.vlgmr.msra.gmra.mxu2 %v225_v38  ;;  %v1316_v34 = vld [vmem:[#allocation8 + $0x28] sm:$0xff] }
  0x36   :  { %701 = vmatpush.bf16.msrb.mxu2 %v1294_v35  ;;  %670 = vmatmul.bf16.vlgmr.msra.gmra.mxu3 %v226_v41 }
  0x37   :  { %714 = vmatpush.bf16.msrb.mxu3 %v1302_v36  ;;  %v1315_v36 = vld [vmem:[#allocation8 + $0x20] sm:$0xff] }
  0x38   :  { %676 = vmatpush.bf16.msrb.mxu0 %v1277_v37 }
  0x39   :  { %689 = vmatpush.bf16.msrb.mxu1 %v1285_v40 }
  0x3a   :  { %702 = vmatpush.bf16.msrb.mxu2 %v1293_v43 }
  0x3b   :  { %715 = vmatpush.bf16.msrb.mxu3 %v1301_v44 }
  0x3c   :  { %677 = vmatpush.bf16.msrb.mxu0 %v1276_v45 }
  0x3d   :  { %690 = vmatpush.bf16.msrb.mxu1 %v1284_v46 }
  0x3e   :  { %703 = vmatpush.bf16.msrb.mxu2 %v1292_v47 }
  0x3f   :  { %716 = vmatpush.bf16.msrb.mxu3 %v1300_v48 }
  0x40   :  { %678 = vmatpush.bf16.msrb.mxu0 %v1275_v49 }
  0x41   :  { %691 = vmatpush.bf16.msrb.mxu1 %v1283_v50 }
  0x42   :  { %704 = vmatpush.bf16.msrb.mxu2 %v1291_v51  ;;  %v1314_v51 = vld [vmem:[#allocation8 + $0x18] sm:$0xff] }
  0x43   :  { %717 = vmatpush.bf16.msrb.mxu3 %v1299_v52  ;;  %v1313_v52 = vld [vmem:[#allocation8 + $0x10] sm:$0xff] }
  0x44   :  { %679 = vmatpush.bf16.msrb.mxu0 %v1274_v53  ;;  %v1312_v53 = vld [vmem:[#allocation8 + $0x8] sm:$0xff] }
  0x45   :  { %692 = vmatpush.bf16.msrb.mxu1 %v1282_v54  ;;  %v1311_v54 = vld [vmem:[#allocation8] sm:$0xff] }
  0x46   :  { %705 = vmatpush.bf16.msrb.mxu2 %v1290_v55  ;;  %v1327_v55 = vld [vmem:[%s1536_s4] ss:$0 sm:$0xff]  ;;  %s907_s4 = sshll.u32 %s1539_s7, 4  ;;  %s908_s4 = int_to_ptr.hbm [resolvable:$true] %s907_s4 }
  0x47   :  { %718 = vmatpush.bf16.msrb.mxu3 %v1298_v56 }
  0x48   :  { %680 = vmatpush.bf16.msrb.mxu0 %v1273_v57 }
  0x49   :  { %693 = vmatpush.bf16.msrb.mxu1 %v1281_v58 }
  0x4a   :  { %706 = vmatpush.bf16.msrb.mxu2 %v1289_v59 }
  0x4b   :  { %719 = vmatpush.bf16.msrb.mxu3 %v1297_v60 }
  0x4c   :  { %681 = vmatpush.bf16.msrb.mxu0 %v1272_v61 }
  0x4d   :  { %694 = vmatpush.bf16.msrb.mxu1 %v1280_v62 }
  0x4e   :  { %707 = vmatpush.bf16.msrb.mxu2 %v1288_v63 }
  0x4f   :  { %720 = vmatpush.bf16.msrb.mxu3 %v1296_v0  ;;  %v1328_v0 = vld [vmem:[%s1538_s6] ss:$0 sm:$0xff] }
  0x50   :  { %682 = vmatpush.bf16.msrb.mxu0 %v1271_v1 }
  0x51   :  { %695 = vmatpush.bf16.msrb.mxu1 %v1279_v2 }
  0x52   :  { %708 = vmatpush.bf16.msrb.mxu2 %v1287_v3 }
  0x53   :  { %721 = vmatpush.bf16.msrb.mxu3 %v1295_v4  ;;  %683 = vmatmul.bf16.vlgmr.msrb.gmra.mxu0 %v227_v5 }
  0x54   :  { %696 = vmatmul.bf16.vlgmr.msrb.gmra.mxu1 %v228_v6  ;;  %800 = vmatpush.bf16.msra.mxu0 %v1310_v9 }
  0x55   :  { %709 = vmatmul.bf16.vlgmr.msrb.gmra.mxu2 %v229_v7  ;;  %886 = vmatpush.bf16.msra.mxu1 %v1318_v28 }
  0x56   :  { %722 = vmatmul.bf16.vlgmr.msrb.gmra.mxu3 %v230_v8 }
  0x58   :  { %801 = vmatpush.bf16.msra.mxu0 %v1309_v10 }
  0x59   :  { %887 = vmatpush.bf16.msra.mxu1 %v1317_v30 }
  0x5c   :  { %802 = vmatpush.bf16.msra.mxu0 %v1308_v11 }
  0x5d   :  { %888 = vmatpush.bf16.msra.mxu1 %v1316_v34 }
  0x60   :  { %803 = vmatpush.bf16.msra.mxu0 %v1307_v14 }
  0x61   :  { %889 = vmatpush.bf16.msra.mxu1 %v1315_v36 }
  0x64   :  { %804 = vmatpush.bf16.msra.mxu0 %v1306_v17 }
  0x65   :  { %890 = vmatpush.bf16.msra.mxu1 %v1314_v51 }
  0x68   :  { %805 = vmatpush.bf16.msra.mxu0 %v1305_v20 }
  0x69   :  { %891 = vmatpush.bf16.msra.mxu1 %v1313_v52 }
  0x6c   :  { %806 = vmatpush.bf16.msra.mxu0 %v1304_v24 }
  0x6d   :  { %892 = vmatpush.bf16.msra.mxu1 %v1312_v53 }
  0x70   :  { %807 = vmatpush.bf16.msra.mxu0 %v1303_v26 }
  0x71   :  { %893 = vmatpush.bf16.msra.mxu1 %v1311_v54 }
  0xb0   :  { %v632_v12 = vpop.f32.mrf.mxu0 }
  0xb1   :  { %v645_v13 = vpop.f32.mrf.mxu1  ;;  %v633_v25 = vadd.f32 %v1326_v21, %v632_v12 }
  0xb3   :  { %v646_v27 = vadd.f32 %v645_v13, %v633_v25 }
  0xb8   :  { %v658_v15 = vpop.f32.mrf.mxu2  ;;  %v634_v18 = vpop.f32.mrf.mxu0 }
  0xb9   :  { %v671_v16 = vpop.f32.mrf.mxu3  ;;  %v647_v19 = vpop.f32.mrf.mxu1  ;;  %v659_v29 = vadd.f32 %v658_v15, %v646_v27 }
  0xbb   :  { %v672_v31 = vadd.f32 %v671_v16, %v659_v29 }
  0xc0   :  { %v660_v22 = vpop.f32.mrf.mxu2 }
  0xc1   :  { %v673_v23 = vpop.f32.mrf.mxu3 }
  0xd0   :  { %v684_v32 = vpop.f32.mrf.mxu0 }
  0xd1   :  { %v697_v33 = vpop.f32.mrf.mxu1  ;;  %v685_v35 = vadd.f32 %v684_v32, %v672_v31 }
  0xd3   :  { %v698_v37 = vadd.f32 %v697_v33, %v685_v35 }
  0xd8   :  { %v710_v38 = vpop.f32.mrf.mxu2  ;;  %v686_v41 = vpop.f32.mrf.mxu0 }
  0xd9   :  { %v723_v39 = vpop.f32.mrf.mxu3  ;;  %v711_v40 = vadd.f32 %v710_v38, %v698_v37  ;;  %v699_v42 = vpop.f32.mrf.mxu1 }
  0xdb   :  { %v724_v43 = vadd.f32 %v723_v39, %v711_v40 }
  0xdd   :  { %v727_v44 = vmul.f32 0.5, %v724_v43 }
  0xdf   :  { %1329 = vtanh.f32 %v727_v44 }
  0xe0   :  { %v712_v45 = vpop.f32.mrf.mxu2 }
  0xe1   :  { %v725_v46 = vpop.f32.mrf.mxu3 }
  0xe5   :  { %v1330_v47 = vpop.eup %1329 }
  0xe6   :  { %v729_v48 = vmul.f32 0.5, %v1330_v47 }
  0xe8   :  { %v730_v49 = vadd.f32 0.5, %v729_v48 }
  0xea   :  { %v731_v50 = vpack.c.bf16 %v730_v49, %v730_v49 }
  0xec   :  { %808 = vmatmul.bf16.vlgmr.msra.gmra.mxu0 %v731_v50 }
 0x169   :  { %v809_v56 = vpop.f32.mrf.mxu0 }
 0x16a   :  { %v810_v57 = vadd.f32 %v1327_v55, %v809_v56 }
 0x16c   :  { %v813_v58 = vmul.f32 0.5, %v810_v57 }
 0x16e   :  { %1331 = vtanh.f32 %v813_v58 }
 0x171   :  { %v811_v59 = vpop.f32.mrf.mxu0 }
 0x174   :  { %v1332_v60 = vpop.eup %1331 }
 0x175   :  { %v815_v61 = vmul.f32 0.5, %v1332_v60 }
 0x177   :  { %v816_v62 = vadd.f32 0.5, %v815_v61 }
 0x179   :  { %v817_v63 = vpack.c.bf16 %v816_v62, %v816_v62 }
 0x17b   :  { %894 = vmatmul.bf16.vlgmr.msra.gmra.mxu1 %v817_v63 }
 0x1f8   :  { %v895_v1 = vpop.f32.mrf.mxu1 }
 0x1f9   :  { %v896_v2 = vadd.f32 %v1328_v0, %v895_v1 }
 0x1fb   :  { %899 = vst [vmem:[#allocation10] sm:$0x3] %v896_v2 }
 0x1fc   :  { %910 = dma.vmem_to_hbm [thread:$0]  %s906_s25, 32, %s908_s4, [#allocation4]  }
 0x200   :  { %v897_v3 = vpop.f32.mrf.mxu1 }
 0x201   :  { %1459 = dma.done.wait [#allocation4], 32  }
 0x202   :  { %1460 = vsyncadd [#allocation4], 4294967264 }
 0x203   :  { %915 = vsyncpa [#allocation3], 1 }
 0x204   :  { %916 = vsyncpa [#allocation6], 1 }
 0x205   :  { %917 = vsyncpa [#allocation9], 1 }
 0x206   :  { %918 = vsyncpa [#allocation4], 1 }

</bundles_post_ra>
